<compile_context>
chip_gen: v7x
topology: tpu7x:2x2x1
jax: 0.10.0
libtpu: 0.0.40
codegen_flags: <defaults>
</compile_context>

<pallas_src>
import functools

import jax
import jax.numpy as jnp
from jax.experimental import pallas as pl
from jax.experimental.pallas import tpu as pltpu

EPS = 1e-5


def _round_up(x, m):
    return (x + m - 1) // m * m


def _cdiv(a, b):
    return -(-a // b)


def _conv_gemm_stats_kernel(w_ref, p_ref, y_ref, sum_ref, ssq_ref, acc_ref):
    """One (C2p, tm) output tile: K-tiled MXU GEMM + per-tile channel sum / sum-of-squares."""
    k = pl.program_id(1)

    @pl.when(k == 0)
    def _():
        acc_ref[...] = jnp.zeros_like(acc_ref)

    acc_ref[...] += jnp.dot(w_ref[...], p_ref[...], preferred_element_type=jnp.float32)

    @pl.when(k == pl.num_programs(1) - 1)
    def _():
        acc = acc_ref[...]                                   # f32, pre-bias conv output tile
        y_ref[...] = acc.astype(y_ref.dtype)                 # bf16 writeback by default
        sum_ref[...] = jnp.sum(acc, axis=1, keepdims=True)[None]
        ssq_ref[...] = jnp.sum(acc * acc, axis=1, keepdims=True)[None]


@functools.partial(jax.jit, static_argnames=("tm", "tk_max", "gemm_dtype"))
def downsample_forward(x, w, b, gamma, beta, *, tm=1024, tk_max=2048, gemm_dtype=jnp.bfloat16):
    """x: (N, C1, D, H, W);  w: (C2, C1, 3, 3, 3);  b, gamma, beta: (C2,)."""
    del b  # Conv bias cancels exactly under training-mode BatchNorm (batch mean absorbs it).

    N, C1, D, H, W = x.shape
    C2 = w.shape[0]
    Do, Ho, Wo = (D + 1) // 2, (H + 1) // 2, (W + 1) // 2   # kernel=3, stride=2, pad=1

    M = N * Do * Ho * Wo
    K = C1 * 27
    gemm_bytes = jnp.dtype(gemm_dtype).itemsize
    C2p = _round_up(C2, 8 if gemm_bytes == 4 else 16)        # native sublane packing for the dtype

    # --- M tiling: lane axis of every GEMM operand / store; shrink for tiny problems. ---
    tm = min(tm, _round_up(M, 128))
    num_tiles = _cdiv(M, tm)
    m_pad = num_tiles * tm

    # --- K tiling: whole-K blocks when they fit, else split so v7x's 64 MiB VMEM stays bounded. ---
    K_pad = _round_up(K, 128)
    nk = _cdiv(K_pad, tk_max)
    tk = _round_up(_cdiv(K_pad, nk), 128)
    K_pad = nk * tk

    # Rough per-step VMEM need (double-buffered ins/outs + f32 accumulator) -> explicit budget.
    vmem_need = (2 * tk * tm * gemm_bytes            # patches tile
                 + 2 * C2p * tk * gemm_bytes         # weight tile
                 + 2 * C2p * tm * gemm_bytes         # y tile
                 + C2p * tm * 4                      # f32 accumulator scratch
                 + (1 << 20))
    vmem_limit = int(min(max(2 * vmem_need, 32 << 20), 48 << 20))

    # --- im2col glue (XLA data movement), carried in gemm_dtype and transposed to (K, M) so M
    #     lands on the 128-lane axis of every GEMM operand and output tile. ---
    # TODO(synk): replace with in-kernel manual-DMA gather to drop this HBM round-trip.
    xp = jnp.pad(x.astype(gemm_dtype), ((0, 0), (0, 0), (1, 1), (1, 1), (1, 1)))
    cols = []
    for kd in range(3):
        for kh in range(3):
            for kw in range(3):
                cols.append(xp[:, :, kd:kd + 2 * Do:2, kh:kh + 2 * Ho:2, kw:kw + 2 * Wo:2])
    # (27, N, C1, Do, Ho, Wo) -> (C1, 27, N, Do, Ho, Wo) -> (K, M), K ordered (c1, kd, kh, kw).
    patches_t = jnp.stack(cols, axis=0).transpose(2, 0, 1, 3, 4, 5).reshape(K, M)
    patches_t = jnp.pad(patches_t, ((0, K_pad - K), (0, m_pad - M)))

    # (C2, C1, 3, 3, 3) -> (C2, K); same K ordering as patches_t.
    w_t = jnp.pad(w.reshape(C2, K), ((0, C2p - C2), (0, K_pad - K))).astype(gemm_dtype)

    # --- Kernel A: K-tiled conv GEMM + per-tile channel statistics (single Pallas pass). ---
    y, tsum, tssq = pl.pallas_call(
        _conv_gemm_stats_kernel,
        out_shape=(
            jax.ShapeDtypeStruct((C2p, m_pad), gemm_dtype),          # conv output (bf16 default)
            jax.ShapeDtypeStruct((num_tiles, C2p, 1), jnp.float32),  # per-tile channel sums
            jax.ShapeDtypeStruct((num_tiles, C2p, 1), jnp.float32),  # per-tile sum-of-squares
        ),
        grid=(num_tiles, nk),
        in_specs=[
            pl.BlockSpec((C2p, tk), lambda i, k: (0, k)),   # weights (resident when nk == 1)
            pl.BlockSpec((tk, tm), lambda i, k: (k, i)),    # patches stream
        ],
        out_specs=(
            pl.BlockSpec((C2p, tm), lambda i, k: (0, i)),
            pl.BlockSpec((1, C2p, 1), lambda i, k: (i, 0, 0)),
            pl.BlockSpec((1, C2p, 1), lambda i, k: (i, 0, 0)),
        ),
        scratch_shapes=[pltpu.VMEM((C2p, tm), jnp.float32)],
        compiler_params=pltpu.CompilerParams(
            dimension_semantics=("parallel", "arbitrary"),
            vmem_limit_bytes=vmem_limit),
    )(w_t, patches_t)

    # --- Tiny (C2,)-sized wrapper math: reduce per-tile partials, build scale / shift once. ---
    total = jnp.sum(tsum, axis=0)[:C2, 0]
    total_sq = jnp.sum(tssq, axis=0)[:C2, 0]
    mean = total / M
    var = jnp.maximum(total_sq / M - mean * mean, 0.0)       # biased variance (training-mode BN)
    inv_std = jax.lax.rsqrt(var + EPS)
    g32 = gamma.astype(jnp.float32)
    scale = (g32 * inv_std).reshape(C2, 1)
    shift = (beta.astype(jnp.float32) - mean * g32 * inv_std).reshape(C2, 1)

    # --- Single fused epilogue pass over y: BN affine + un-pad + NCDHW relayout + cast. ---
    out_t = y[:C2, :M].astype(jnp.float32) * scale + shift
    out = out_t.reshape(C2, N, Do, Ho, Wo).transpose(1, 0, 2, 3, 4)
    return out.astype(x.dtype)


def _reference(x, w, b, gamma, beta):
    y = jax.lax.conv_general_dilated(
        x, w, window_strides=(2, 2, 2), padding=((1, 1), (1, 1), (1, 1)),
        dimension_numbers=("NCDHW", "OIDHW", "NCDHW"))
    y = y + b.reshape(1, -1, 1, 1, 1)
    mean = y.mean(axis=(0, 2, 3, 4), keepdims=True)
    var = y.var(axis=(0, 2, 3, 4), keepdims=True)            # biased, as in training-mode BN
    return ((y - mean) * jax.lax.rsqrt(var + EPS)
            * gamma.reshape(1, -1, 1, 1, 1) + beta.reshape(1, -1, 1, 1, 1))


if __name__ == "__main__":
    key = jax.random.PRNGKey(0)
    k_x, k_w, k_b, k_g, k_be = jax.random.split(key, 5)

    N, C1, C2, D, H, W = 2, 4, 8, 8, 8, 8
    x = jax.random.normal(k_x, (N, C1, D, H, W), jnp.float32)

    fan_in = C1 * 3 * 3 * 3
    bound = 1.0 / (fan_in ** 0.5)
    w = jax.random.uniform(k_w, (C2, C1, 3, 3, 3), jnp.float32, -bound, bound)
    b = jax.random.uniform(k_b, (C2,), jnp.float32, -bound, bound)
    gamma = jax.random.uniform(k_g, (C2,), jnp.float32, 0.5, 1.5)
    beta = jax.random.uniform(k_be, (C2,), jnp.float32, -0.5, 0.5)

    ref = jax.block_until_ready(_reference(x, w, b, gamma, beta))

    # Exact-numerics path (f32 GEMM inputs / f32 conv intermediate).
    out_f32 = jax.block_until_ready(
        downsample_forward(x, w, b, gamma, beta, gemm_dtype=jnp.float32))
    assert out_f32.shape == (N, C2, D // 2, H // 2, W // 2), out_f32.shape
    assert jnp.allclose(out_f32, ref, rtol=1e-3, atol=1e-3), float(jnp.abs(out_f32 - ref).max())

    # Default bandwidth-optimized path (bf16 GEMM inputs + bf16 conv intermediate, f32 accumulation
    # and f32 BN statistics): expect ~1e-3..1e-2 absolute error on the normalized output.
    out = jax.block_until_ready(downsample_forward(x, w, b, gamma, beta))
    assert out.shape == (N, C2, D // 2, H // 2, W // 2), out.shape
    assert jnp.allclose(out, ref, rtol=1e-2, atol=2e-2), float(jnp.abs(out - ref).max())

    print("KERNEL_OK")
</pallas_src>

<mosaic_0001>
module attributes {stable_mosaic.version = 11 : i64} {
  func.func @_conv_gemm_stats_kernel(%arg0: i32, %arg1: i32, %arg2: memref<8x128xf32, #tpu.memory_space<vmem>>, %arg3: memref<128x128xf32, #tpu.memory_space<vmem>>, %arg4: memref<8x128xf32, #tpu.memory_space<vmem>>, %arg5: memref<1x8x1xf32, #tpu.memory_space<vmem>>, %arg6: memref<1x8x1xf32, #tpu.memory_space<vmem>>, %arg7: memref<8x128xf32, #tpu.memory_space<vmem>>) attributes {dimension_semantics = [#tpu.dimension_semantics<parallel>, #tpu.dimension_semantics<arbitrary>], iteration_bounds = array<i64: 1, 1>, scalar_prefetch = 0 : i64, scratch_operands = 1 : i64, tpu.core_type = #tpu.core_type<tc>, window_params = [{transform_indices = @transform_0, window_bounds = array<i64: 8, 128>}, {transform_indices = @transform_1, window_bounds = array<i64: 128, 128>}, {transform_indices = @transform_2, window_bounds = array<i64: 8, 128>}, {transform_indices = @transform_3, window_bounds = array<i64: 1, 8, 1>}, {transform_indices = @transform_4, window_bounds = array<i64: 1, 8, 1>}]} {
    %c0_i32 = arith.constant 0 : i32
    %0 = arith.cmpi eq, %arg1, %c0_i32 : i32
    %1 = arith.extui %0 : i1 to i32
    %c0_i32_0 = arith.constant 0 : i32
    %2 = arith.cmpi ne, %1, %c0_i32_0 : i32
    scf.if %2 {
      %cst_10 = arith.constant 0.000000e+00 : f32
      %12 = vector.broadcast %cst_10 : f32 to vector<8x128xf32>
      %c0_11 = arith.constant 0 : index
      %c0_12 = arith.constant 0 : index
      %13 = vector.load %arg7[%c0_11, %c0_12] : memref<8x128xf32, #tpu.memory_space<vmem>>, vector<8x128xf32>
      tpu.vector_store %arg7[%c0_11, %c0_12], %12 {strides = array<i32>} : memref<8x128xf32, #tpu.memory_space<vmem>>, vector<8x128xf32>,
    } else {
    }
    %c0 = arith.constant 0 : index
    %c0_1 = arith.constant 0 : index
    %3 = vector.load %arg7[%c0, %c0_1] : memref<8x128xf32, #tpu.memory_space<vmem>>, vector<8x128xf32>
    %c0_2 = arith.constant 0 : index
    %c0_3 = arith.constant 0 : index
    %4 = vector.load %arg2[%c0_2, %c0_3] : memref<8x128xf32, #tpu.memory_space<vmem>>, vector<8x128xf32>
    %c0_4 = arith.constant 0 : index
    %c0_5 = arith.constant 0 : index
    %5 = vector.load %arg3[%c0_4, %c0_5] : memref<128x128xf32, #tpu.memory_space<vmem>>, vector<128x128xf32>
    %cst = arith.constant dense<0.000000e+00> : vector<8x128xf32>
    %6 = tpu.matmul %4, %5, %cst {dimension_numbers = #tpu.dot_dimension_numbers<[1], [0], [0], [1], [0, 0, 1, 1], [], []>} : vector<8x128xf32>, vector<128x128xf32>, vector<8x128xf32> -> vector<8x128xf32>
    %7 = arith.addf %3, %6 : vector<8x128xf32>
    %c0_6 = arith.constant 0 : index
    %c0_7 = arith.constant 0 : index
    %8 = vector.load %arg7[%c0_6, %c0_7] : memref<8x128xf32, #tpu.memory_space<vmem>>, vector<8x128xf32>
    tpu.vector_store %arg7[%c0_6, %c0_7], %7 {strides = array<i32>} : memref<8x128xf32, #tpu.memory_space<vmem>>, vector<8x128xf32>,
    %c0_i32_8 = arith.constant 0 : i32
    %9 = arith.cmpi eq, %arg1, %c0_i32_8 : i32
    %10 = arith.extui %9 : i1 to i32
    %c0_i32_9 = arith.constant 0 : i32
    %11 = arith.cmpi ne, %10, %c0_i32_9 : i32
    scf.if %11 {
      %c0_10 = arith.constant 0 : index
      %c0_11 = arith.constant 0 : index
      %12 = vector.load %arg7[%c0_10, %c0_11] : memref<8x128xf32, #tpu.memory_space<vmem>>, vector<8x128xf32>
      %c0_12 = arith.constant 0 : index
      %c0_13 = arith.constant 0 : index
      %13 = vector.load %arg4[%c0_12, %c0_13] : memref<8x128xf32, #tpu.memory_space<vmem>>, vector<8x128xf32>
      tpu.vector_store %arg4[%c0_12, %c0_13], %12 {strides = array<i32>} : memref<8x128xf32, #tpu.memory_space<vmem>>, vector<8x128xf32>,
      %cst_14 = arith.constant dense<0.000000e+00> : vector<8xf32>
      %14 = vector.multi_reduction <add>, %12, %cst_14 [1] : vector<8x128xf32> to vector<8xf32>
      %15 = vector.shape_cast %14 : vector<8xf32> to vector<8x1xf32>
      %16 = vector.shape_cast %15 : vector<8x1xf32> to vector<1x8x1xf32>
      %c0_15 = arith.constant 0 : index
      %c0_16 = arith.constant 0 : index
      %c0_17 = arith.constant 0 : index
      %17 = vector.load %arg5[%c0_15, %c0_16, %c0_17] : memref<1x8x1xf32, #tpu.memory_space<vmem>>, vector<1x8x1xf32>
      tpu.vector_store %arg5[%c0_15, %c0_16, %c0_17], %16 {strides = array<i32>} : memref<1x8x1xf32, #tpu.memory_space<vmem>>, vector<1x8x1xf32>,
      %18 = arith.mulf %12, %12 : vector<8x128xf32>
      %cst_18 = arith.constant dense<0.000000e+00> : vector<8xf32>
      %19 = vector.multi_reduction <add>, %18, %cst_18 [1] : vector<8x128xf32> to vector<8xf32>
      %20 = vector.shape_cast %19 : vector<8xf32> to vector<8x1xf32>
      %21 = vector.shape_cast %20 : vector<8x1xf32> to vector<1x8x1xf32>
      %c0_19 = arith.constant 0 : index
      %c0_20 = arith.constant 0 : index
      %c0_21 = arith.constant 0 : index
      %22 = vector.load %arg6[%c0_19, %c0_20, %c0_21] : memref<1x8x1xf32, #tpu.memory_space<vmem>>, vector<1x8x1xf32>
      tpu.vector_store %arg6[%c0_19, %c0_20, %c0_21], %21 {strides = array<i32>} : memref<1x8x1xf32, #tpu.memory_space<vmem>>, vector<1x8x1xf32>,
    } else {
    }
    return
  }
  func.func @transform_0(%arg0: i32, %arg1: i32) -> (i32, i32) {
    %c0_i32 = arith.constant 0 : i32
    %c0_i32_0 = arith.constant 0 : i32
    return %c0_i32, %arg1 : i32, i32
  }
  func.func @transform_1(%arg0: i32, %arg1: i32) -> (i32, i32) {
    %c0_i32 = arith.constant 0 : i32
    return %arg1, %arg0 : i32, i32
  }
  func.func @transform_2(%arg0: i32, %arg1: i32) -> (i32, i32) {
    %c0_i32 = arith.constant 0 : i32
    %c0_i32_0 = arith.constant 0 : i32
    return %c0_i32, %arg0 : i32, i32
  }
  func.func @transform_3(%arg0: i32, %arg1: i32) -> (i32, i32, i32) {
    %c0_i32 = arith.constant 0 : i32
    %c0_i32_0 = arith.constant 0 : i32
    %c0_i32_1 = arith.constant 0 : i32
    return %arg0, %c0_i32, %c0_i32_0 : i32, i32, i32
  }
  func.func @transform_4(%arg0: i32, %arg1: i32) -> (i32, i32, i32) {
    %c0_i32 = arith.constant 0 : i32
    %c0_i32_0 = arith.constant 0 : i32
    %c0_i32_1 = arith.constant 0 : i32
    return %arg0, %c0_i32, %c0_i32_0 : i32, i32, i32
  }
}

</mosaic_0001>

<bundles_post_ra>
// kernel: downsample_forward.1
= control target key start
LH: loop header
LB: loop body
LE: loop exit
PB: predicated region body
PF: predicated region fallthrough
CT: control target
= control target key end

     0   :  { %v213_v0 = vmov 0.0|0.0   ;;  %vm214_vm0 = vmmov 0   ;;  %v215_v4 = vmov 0.0   ;;  %vm116_vm1 = vcmask 7168   ;;  %s301_s1 = inlined_call_operand.vmem [shape: f32[128,128], index: 1, kind: input, shape index: {}]   ;;  %s302_s0 = inlined_call_operand.vmem [shape: f32[8,128], index: 0, kind: input, shape index: {}]   ;;  %s303_s2 = inlined_call_operand.vmem [shape: f32[8,128], index: 2, kind: output, shape index: {0}]   ;;  %s304_s3 = inlined_call_operand.vmem [shape: f32[1,8,1], index: 3, kind: output, shape index: {1}]   ;;  %s305_s4 = inlined_call_operand.vmem [shape: f32[1,8,1], index: 4, kind: output, shape index: {2}]  }
   0x1   :  { %186 = vmatprep.subr.bf16.mxu0 %v213_v0  ;;  %v21_v1 = vld [vmem:[%s301_s1] sm:$0xff]  ;;  %v22_v2 = vld [vmem:[%s301_s1 + $0x8] sm:$0xff]  ;;  %v23_v3 = vld [vmem:[%s301_s1 + $0x10] sm:$0xff]  ;;  %183 = vmatprep.mubr.msk.f32.mxu0 %vm214_vm0, %v215_v4 }
   0x2   :  { %v187_v5 = vpack.c.bf16 %v22_v2, %v21_v1  ;;  %v24_v6 = vld [vmem:[%s301_s1 + $0x18] sm:$0xff]  ;;  %v25_v8 = vld [vmem:[%s301_s1 + $0x20] sm:$0xff]  ;;  %v26_v9 = vld [vmem:[%s301_s1 + $0x28] sm:$0xff] }
   0x3   :  { %v190_v7 = vpack.c.bf16 %v24_v6, %v23_v3  ;;  %v193_v10 = vpack.c.bf16 %v26_v9, %v25_v8  ;;  %v27_v11 = vld [vmem:[%s301_s1 + $0x30] sm:$0xff]  ;;  %v28_v12 = vld [vmem:[%s301_s1 + $0x38] sm:$0xff]  ;;  %v29_v14 = vld [vmem:[%s301_s1 + $0x40] sm:$0xff] }
   0x4   :  { %188 = vmatpush3.bf16.msra.mxu0 %v187_v5  ;;  %v196_v13 = vpack.c.bf16 %v28_v12, %v27_v11  ;;  %v30_v15 = vld [vmem:[%s301_s1 + $0x48] sm:$0xff]  ;;  %v31_v17 = vld [vmem:[%s301_s1 + $0x50] sm:$0xff]  ;;  %v32_v18 = vld [vmem:[%s301_s1 + $0x58] sm:$0xff] }
   0x5   :  { %189 = vmatprep.subr.bf16.mxu0 %v213_v0  ;;  %v199_v16 = vpack.c.bf16 %v30_v15, %v29_v14  ;;  %v202_v19 = vpack.c.bf16 %v32_v18, %v31_v17  ;;  %v33_v20 = vld [vmem:[%s301_s1 + $0x60] sm:$0xff]  ;;  %v34_v21 = vld [vmem:[%s301_s1 + $0x68] sm:$0xff]  ;;  %v35_v23 = vld [vmem:[%s301_s1 + $0x70] sm:$0xff] }
   0x6   :  { %v205_v22 = vpack.c.bf16 %v34_v21, %v33_v20  ;;  %v36_v24 = vld [vmem:[%s301_s1 + $0x78] sm:$0xff]  ;;  %v20_v26 = vld [vmem:[%s302_s0] sm:$0xff] }
   0x7   :  { %v208_v25 = vpack.c.bf16 %v36_v24, %v35_v23 }
   0x8   :  { %191 = vmatpush3.bf16.msra.mxu0 %v190_v7 }
   0x9   :  { %192 = vmatprep.subr.bf16.mxu0 %v213_v0 }
   0xc   :  { %194 = vmatpush3.bf16.msra.mxu0 %v193_v10 }
   0xd   :  { %195 = vmatprep.subr.bf16.mxu0 %v213_v0 }
  0x10   :  { %197 = vmatpush3.bf16.msra.mxu0 %v196_v13 }
  0x11   :  { %198 = vmatprep.subr.bf16.mxu0 %v213_v0 }
  0x14   :  { %200 = vmatpush3.bf16.msra.mxu0 %v199_v16 }
  0x15   :  { %201 = vmatprep.subr.bf16.mxu0 %v213_v0 }
  0x18   :  { %203 = vmatpush3.bf16.msra.mxu0 %v202_v19 }
  0x19   :  { %204 = vmatprep.subr.bf16.mxu0 %v213_v0 }
  0x1c   :  { %206 = vmatpush3.bf16.msra.mxu0 %v205_v22 }
  0x1d   :  { %207 = vmatprep.subr.bf16.mxu0 %v213_v0 }
  0x20   :  { %209 = vmatpush3.bf16.msra.mxu0 %v208_v25 }
  0x23   :  { %184 = vmatmul.mubr.f32.vlgmr.msra.gmra.mrb[0].mxu0 %v20_v26 }
  0xf6   :  { %v103_v27 = vpop.f32.mrb[0].mxu0 }
  0xf7   :  { %113 = vst [vmem:[%s303_s2] sm:$0xff] %v103_v27  ;;  %114 = vadd.xlane.f32.xlu0 %v103_v27  ;;  %v185_v28 = vpop.f32.mrb[1].mxu0  ;;  %v118_v29 = vmul.f32 %v103_v27, %v103_v27 }
  0xfb   :  { %119 = vadd.xlane.f32.xlu0 %v118_v29 }
 0x184   :  { %v115_v30 = vpop.xlane.xlu0 %114 }
 0x185   :  { %117 = vst.msk [vmem:[%s304_s3] sm:$0xff] %vm116_vm1, %v115_v30 }
 0x188   :  { %v120_v31 = vpop.xlane.xlu0 %119 }
 0x189   :  { %121 = vst.msk [vmem:[%s305_s4] sm:$0xff] %vm116_vm1, %v120_v31 }

</bundles_post_ra>
